<compile_context>
chip_gen: v6e
topology: v6e:2x2x1
jax: 0.10.0
libtpu: 0.0.40
codegen_flags: <defaults>
</compile_context>

<pallas_src>
import functools
import math

import jax
import jax.numpy as jnp
from jax.experimental import pallas as pl
from jax.experimental.pallas import tpu as pltpu


def _flash_qkv_kernel(q_ref, k_ref, v_ref, o_ref, m_scr, l_scr, acc_scr, *, scale_sq):
    """One (head_block, q_tile, kv_tile) step of online-softmax attention.

    q_ref: [hb, tq, C]   k_ref/v_ref: [hb, tk, C]   o_ref: [hb, tq, C]
    m_scr/l_scr: [hb, tq, 1] f32      acc_scr: [hb, tq, C] f32
    """
    j = pl.program_id(2)

    @pl.when(j == 0)
    def _init():
        m_scr[...] = jnp.full_like(m_scr, -jnp.inf)
        l_scr[...] = jnp.zeros_like(l_scr)
        acc_scr[...] = jnp.zeros_like(acc_scr)

    # Operands stay in the input dtype (bf16 -> bf16 MXU); scale^2 folded into q.
    q = q_ref[...] * scale_sq          # [hb, tq, C], input dtype (weak-typed scalar)
    k = k_ref[...]                     # [hb, tk, C]
    v = v_ref[...]                     # [hb, tk, C]

    # scores[h, q, k] = sum_c q[h, q, c] * k[h, k, c], f32 accumulation on the MXU.
    s = jnp.einsum('hqc,hkc->hqk', q, k,
                   preferred_element_type=jnp.float32)       # [hb, tq, tk] f32

    m_prev = m_scr[...]                                       # [hb, tq, 1]
    m_new = jnp.maximum(m_prev, jnp.max(s, axis=-1, keepdims=True))
    alpha = jnp.exp(m_prev - m_new)                           # rescale of old stats
    p = jnp.exp(s - m_new)                                    # [hb, tq, tk] f32

    l_scr[...] = alpha * l_scr[...] + jnp.sum(p, axis=-1, keepdims=True)
    # Probabilities cast back to the input dtype before the PV matmul (matches
    # PyTorch's `.type(weight.dtype)`); unnormalized accumulation (deferred softmax).
    acc_scr[...] = alpha * acc_scr[...] + jnp.einsum(
        'hqk,hkc->hqc', p.astype(v.dtype), v, preferred_element_type=jnp.float32)
    m_scr[...] = m_new

    @pl.when(j == pl.num_programs(2) - 1)
    def _finalize():
        # Deferred normalization: tq reciprocals on the EUP + a [tq, C] multiply,
        # instead of a [T, T] divide.
        inv_l = pl.reciprocal(l_scr[...], approx=True)        # [hb, tq, 1]
        o_ref[...] = (acc_scr[...] * inv_l).astype(o_ref.dtype)


def _seq_tile(t):
    """Largest 'nice' sequence tile that divides t (falls back to full length)."""
    for cand in (512, 256, 128):
        if t % cand == 0:
            return cand
    return t


def _pick_heads_per_block(bh, tq, tk, ch, elt_bytes, budget_bytes=8 << 20):
    """Largest head-pack factor whose per-step working set fits the budget."""
    for cand in (16, 8, 4, 2, 1):
        if bh % cand != 0:
            continue
        blk = cand * (2 * tq + 2 * tk) * ch * elt_bytes       # q, o + k, v blocks
        scratch = cand * tq * (ch + 2) * 4                    # f32 acc + m + l
        score = cand * tq * tk * 4                            # live f32 scores/probs
        if 2 * blk + scratch + 2 * score <= budget_bytes:
            return cand
    return 1


def qkv_attention(qkv, num_heads, encoder_kv=None, *,
                  q_tile=None, kv_tile=None, heads_per_block=None):
    """qkv: [B, H*C*3, T] (+ optional encoder_kv [B, H*C*2, S]) -> [B, H*C, T]."""
    bs, width, length = qkv.shape
    assert width % (3 * num_heads) == 0
    ch = width // (3 * num_heads)
    scale = 1.0 / math.sqrt(math.sqrt(ch))
    scale_sq = scale * scale  # fold both q*scale and k*scale into q * scale^2

    bh = bs * num_heads

    # Sequence-major layout in the wrapper (one XLA transpose pass per operand) so
    # both kernel matmuls are canonical and the softmax axis sits on lanes.
    qkv_r = qkv.reshape(bh, 3, ch, length)
    q = jnp.swapaxes(qkv_r[:, 0], 1, 2)   # [bh, T, C]
    k = jnp.swapaxes(qkv_r[:, 1], 1, 2)   # [bh, T, C]
    v = jnp.swapaxes(qkv_r[:, 2], 1, 2)   # [bh, T, C]

    if encoder_kv is not None:
        eb, ewidth, elen = encoder_kv.shape
        assert eb == bs and ewidth == num_heads * ch * 2
        e_r = encoder_kv.reshape(bh, 2, ch, elen)
        ek = jnp.swapaxes(e_r[:, 0], 1, 2)   # [bh, S, C]
        ev = jnp.swapaxes(e_r[:, 1], 1, 2)   # [bh, S, C]
        k = jnp.concatenate([ek, k], axis=1)  # [bh, S+T, C]
        v = jnp.concatenate([ev, v], axis=1)

    kv_len = k.shape[1]

    # --- tile selection -----------------------------------------------------
    tq = q_tile if q_tile is not None else _seq_tile(length)
    tk = kv_tile if kv_tile is not None else _seq_tile(kv_len)
    elt = jnp.dtype(qkv.dtype).itemsize
    hb = (heads_per_block if heads_per_block is not None
          else _pick_heads_per_block(bh, tq, tk, ch, elt))
    assert bh % hb == 0 and length % tq == 0 and kv_len % tk == 0

    nq, nk = length // tq, kv_len // tk
    grid = (bh // hb, nq, nk)

    # Explicit VMEM budget: double-buffered in/out blocks + scratch + live score tile,
    # with ~2x headroom.  Floor at the 32 MiB scoped default, cap well under v7x's
    # 64 MiB physical per-TC VMEM.
    blk_bytes = hb * (2 * tq + 2 * tk) * ch * elt             # q, o, k, v blocks
    scratch_bytes = hb * tq * (ch + 2) * 4                    # f32 acc + m + l
    score_bytes = hb * tq * tk * 4                            # live f32 scores/probs
    working_set = 2 * blk_bytes + scratch_bytes + 2 * score_bytes
    vmem_limit = int(min(48 << 20, max(32 << 20, 2 * working_set)))

    kernel = functools.partial(_flash_qkv_kernel, scale_sq=scale_sq)

    out_tc = pl.pallas_call(
        kernel,
        out_shape=jax.ShapeDtypeStruct((bh, length, ch), qkv.dtype),
        grid_spec=pltpu.PrefetchScalarGridSpec(
            num_scalar_prefetch=0,
            grid=grid,
            in_specs=[
                pl.BlockSpec((hb, tq, ch), lambda h, i, j: (h, i, 0)),  # q
                pl.BlockSpec((hb, tk, ch), lambda h, i, j: (h, j, 0)),  # k
                pl.BlockSpec((hb, tk, ch), lambda h, i, j: (h, j, 0)),  # v
            ],
            out_specs=pl.BlockSpec((hb, tq, ch), lambda h, i, j: (h, i, 0)),
            scratch_shapes=[
                pltpu.VMEM((hb, tq, 1), jnp.float32),    # running max
                pltpu.VMEM((hb, tq, 1), jnp.float32),    # running sum
                pltpu.VMEM((hb, tq, ch), jnp.float32),   # unnormalized output acc
            ],
        ),
        compiler_params=pltpu.CompilerParams(
            dimension_semantics=("parallel", "parallel", "arbitrary"),
            vmem_limit_bytes=vmem_limit,
        ),
    )(q, k, v)

    # Back to channel-major [B, H*C, T].
    return jnp.swapaxes(out_tc, 1, 2).reshape(bs, num_heads * ch, length)


def _reference_qkv_attention(qkv, num_heads, encoder_kv=None):
    """Pure-JAX replica of the PyTorch forward, for correctness checking."""
    bs, width, length = qkv.shape
    ch = width // (3 * num_heads)
    qkv_r = qkv.reshape(bs * num_heads, 3 * ch, length)
    q, k, v = qkv_r[:, :ch, :], qkv_r[:, ch:2 * ch, :], qkv_r[:, 2 * ch:, :]
    if encoder_kv is not None:
        e_r = encoder_kv.reshape(bs * num_heads, 2 * ch, -1)
        ek, ev = e_r[:, :ch, :], e_r[:, ch:, :]
        k = jnp.concatenate([ek, k], axis=-1)
        v = jnp.concatenate([ev, v], axis=-1)
    scale = 1.0 / math.sqrt(math.sqrt(ch))
    w = jnp.einsum('bct,bcs->bts', q * scale, k * scale)
    w = jax.nn.softmax(w.astype(jnp.float32), axis=-1).astype(qkv.dtype)
    a = jnp.einsum('bts,bcs->bct', w, v)
    return a.reshape(bs, -1, length)


if __name__ == "__main__":
    key = jax.random.PRNGKey(0)
    k1, k2, k3 = jax.random.split(key, 3)

    # Tolerance 2e-3 accounts for the approximate EUP reciprocal (approx=True) and
    # the flash-style re-ordered accumulation (both ~1e-4 relative).
    ATOL = RTOL = 2e-3

    # Config 1: tiny T (single KV tile, several heads packed per grid step).
    B, H, C, T = 2, 2, 16, 8
    qkv1 = jax.random.normal(k1, (B, H * C * 3, T), dtype=jnp.float32)
    out1 = jax.block_until_ready(qkv_attention(qkv1, num_heads=H))
    ref1 = _reference_qkv_attention(qkv1, num_heads=H)
    assert out1.shape == (B, H * C, T), out1.shape
    assert jnp.allclose(out1, ref1, atol=ATOL, rtol=RTOL), (
        "mismatch (config 1), max abs diff = %e" % float(jnp.max(jnp.abs(out1 - ref1))))

    # Config 2: exercises the multi-tile online softmax path (2 q-tiles x 2 kv-tiles).
    B, H, C, T = 2, 4, 32, 256
    qkv2 = jax.random.normal(k2, (B, H * C * 3, T), dtype=jnp.float32)
    out2 = jax.block_until_ready(
        qkv_attention(qkv2, num_heads=H, q_tile=128, kv_tile=128))
    ref2 = _reference_qkv_attention(qkv2, num_heads=H)
    assert out2.shape == (B, H * C, T), out2.shape
    assert jnp.allclose(out2, ref2, atol=ATOL, rtol=RTOL), (
        "mismatch (config 2), max abs diff = %e" % float(jnp.max(jnp.abs(out2 - ref2))))

    # Config 3: cross-attention path (encoder_kv concatenated along the kv axis).
    B, H, C, T, S = 2, 2, 16, 8, 16
    qkv3 = jax.random.normal(k3, (B, H * C * 3, T), dtype=jnp.float32)
    ekv3 = jax.random.normal(jax.random.PRNGKey(7), (B, H * C * 2, S), dtype=jnp.float32)
    out3 = jax.block_until_ready(qkv_attention(qkv3, num_heads=H, encoder_kv=ekv3))
    ref3 = _reference_qkv_attention(qkv3, num_heads=H, encoder_kv=ekv3)
    assert out3.shape == (B, H * C, T), out3.shape
    assert jnp.allclose(out3, ref3, atol=ATOL, rtol=RTOL), (
        "mismatch (config 3), max abs diff = %e" % float(jnp.max(jnp.abs(out3 - ref3))))

    # bf16 smoke test: operands feed the MXU in bf16 with f32 accumulation.
    out_bf16 = jax.block_until_ready(
        qkv_attention(qkv2.astype(jnp.bfloat16), num_heads=H,
                      q_tile=128, kv_tile=128))
    assert bool(jnp.all(jnp.isfinite(out_bf16.astype(jnp.float32))))

    print("KERNEL_OK")
</pallas_src>

<mosaic_0001>
module attributes {stable_mosaic.version = 11 : i64} {
  func.func @_flash_qkv_kernel(%arg0: i32, %arg1: i32, %arg2: i32, %arg3: memref<4x8x16xf32, #tpu.memory_space<vmem>>, %arg4: memref<4x8x16xf32, #tpu.memory_space<vmem>>, %arg5: memref<4x8x16xf32, #tpu.memory_space<vmem>>, %arg6: memref<4x8x16xf32, #tpu.memory_space<vmem>>, %arg7: memref<4x8x1xf32, #tpu.memory_space<vmem>>, %arg8: memref<4x8x1xf32, #tpu.memory_space<vmem>>, %arg9: memref<4x8x16xf32, #tpu.memory_space<vmem>>) attributes {dimension_semantics = [#tpu.dimension_semantics<parallel>, #tpu.dimension_semantics<parallel>, #tpu.dimension_semantics<arbitrary>], iteration_bounds = array<i64: 1, 1, 1>, scalar_prefetch = 0 : i64, scratch_operands = 3 : i64, tpu.core_type = #tpu.core_type<tc>, window_params = [{transform_indices = @transform_0, window_bounds = array<i64: 4, 8, 16>}, {transform_indices = @transform_1, window_bounds = array<i64: 4, 8, 16>}, {transform_indices = @transform_2, window_bounds = array<i64: 4, 8, 16>}, {transform_indices = @transform_3, window_bounds = array<i64: 4, 8, 16>}]} {
    %c0_i32 = arith.constant 0 : i32
    %0 = arith.cmpi eq, %arg2, %c0_i32 : i32
    %1 = arith.extui %0 : i1 to i32
    %c0_i32_0 = arith.constant 0 : i32
    %2 = arith.cmpi ne, %1, %c0_i32_0 : i32
    scf.if %2 {
      %cst_33 = arith.constant 0xFF800000 : f32
      %34 = vector.broadcast %cst_33 : f32 to vector<4x8x1xf32>
      %c0_34 = arith.constant 0 : index
      %c0_35 = arith.constant 0 : index
      %c0_36 = arith.constant 0 : index
      %35 = vector.load %arg7[%c0_34, %c0_35, %c0_36] : memref<4x8x1xf32, #tpu.memory_space<vmem>>, vector<4x8x1xf32>
      tpu.vector_store %arg7[%c0_34, %c0_35, %c0_36], %34 {strides = array<i32>} : memref<4x8x1xf32, #tpu.memory_space<vmem>>, vector<4x8x1xf32>,
      %cst_37 = arith.constant 0.000000e+00 : f32
      %36 = vector.broadcast %cst_37 : f32 to vector<4x8x1xf32>
      %c0_38 = arith.constant 0 : index
      %c0_39 = arith.constant 0 : index
      %c0_40 = arith.constant 0 : index
      %37 = vector.load %arg8[%c0_38, %c0_39, %c0_40] : memref<4x8x1xf32, #tpu.memory_space<vmem>>, vector<4x8x1xf32>
      tpu.vector_store %arg8[%c0_38, %c0_39, %c0_40], %36 {strides = array<i32>} : memref<4x8x1xf32, #tpu.memory_space<vmem>>, vector<4x8x1xf32>,
      %cst_41 = arith.constant 0.000000e+00 : f32
      %38 = vector.broadcast %cst_41 : f32 to vector<4x8x16xf32>
      %c0_42 = arith.constant 0 : index
      %c0_43 = arith.constant 0 : index
      %c0_44 = arith.constant 0 : index
      %39 = vector.load %arg9[%c0_42, %c0_43, %c0_44] : memref<4x8x16xf32, #tpu.memory_space<vmem>>, vector<4x8x16xf32>
      tpu.vector_store %arg9[%c0_42, %c0_43, %c0_44], %38 {strides = array<i32>} : memref<4x8x16xf32, #tpu.memory_space<vmem>>, vector<4x8x16xf32>,
    } else {
    }
    %c0 = arith.constant 0 : index
    %c0_1 = arith.constant 0 : index
    %c0_2 = arith.constant 0 : index
    %3 = vector.load %arg3[%c0, %c0_1, %c0_2] : memref<4x8x16xf32, #tpu.memory_space<vmem>>, vector<4x8x16xf32>
    %cst = arith.constant 2.500000e-01 : f32
    %4 = vector.broadcast %cst : f32 to vector<4x8x16xf32>
    %5 = arith.mulf %3, %4 : vector<4x8x16xf32>
    %c0_3 = arith.constant 0 : index
    %c0_4 = arith.constant 0 : index
    %c0_5 = arith.constant 0 : index
    %6 = vector.load %arg4[%c0_3, %c0_4, %c0_5] : memref<4x8x16xf32, #tpu.memory_space<vmem>>, vector<4x8x16xf32>
    %c0_6 = arith.constant 0 : index
    %c0_7 = arith.constant 0 : index
    %c0_8 = arith.constant 0 : index
    %7 = vector.load %arg5[%c0_6, %c0_7, %c0_8] : memref<4x8x16xf32, #tpu.memory_space<vmem>>, vector<4x8x16xf32>
    "tpu.trace_start"() <{level = 10 : i32, message = "hqc,hkc->hqk"}> : () -> ()
    %cst_9 = arith.constant dense<0.000000e+00> : vector<4x8x8xf32>
    %8 = tpu.matmul %5, %6, %cst_9 {dimension_numbers = #tpu.dot_dimension_numbers<[2], [2], [1], [1], [0, 0, 0, 1, 1, 1], [0], [0]>} : vector<4x8x16xf32>, vector<4x8x16xf32>, vector<4x8x8xf32> -> vector<4x8x8xf32>
    "tpu.trace_stop"() : () -> ()
    %c0_10 = arith.constant 0 : index
    %c0_11 = arith.constant 0 : index
    %c0_12 = arith.constant 0 : index
    %9 = vector.load %arg7[%c0_10, %c0_11, %c0_12] : memref<4x8x1xf32, #tpu.memory_space<vmem>>, vector<4x8x1xf32>
    %cst_13 = arith.constant dense<0xFF800000> : vector<4x8xf32>
    %10 = vector.multi_reduction <maximumf>, %8, %cst_13 [2] : vector<4x8x8xf32> to vector<4x8xf32>
    %11 = vector.shape_cast %10 : vector<4x8xf32> to vector<4x8x1xf32>
    %12 = arith.maximumf %9, %11 : vector<4x8x1xf32>
    %13 = arith.subf %9, %12 : vector<4x8x1xf32>
    %14 = math.exp %13 : vector<4x8x1xf32>
    %15 = vector.broadcast %12 : vector<4x8x1xf32> to vector<4x8x8xf32>
    %16 = arith.subf %8, %15 : vector<4x8x8xf32>
    %17 = math.exp %16 : vector<4x8x8xf32>
    %c0_14 = arith.constant 0 : index
    %c0_15 = arith.constant 0 : index
    %c0_16 = arith.constant 0 : index
    %18 = vector.load %arg8[%c0_14, %c0_15, %c0_16] : memref<4x8x1xf32, #tpu.memory_space<vmem>>, vector<4x8x1xf32>
    %19 = arith.mulf %14, %18 : vector<4x8x1xf32>
    %cst_17 = arith.constant dense<0.000000e+00> : vector<4x8xf32>
    %20 = vector.multi_reduction <add>, %17, %cst_17 [2] : vector<4x8x8xf32> to vector<4x8xf32>
    %21 = vector.shape_cast %20 : vector<4x8xf32> to vector<4x8x1xf32>
    %22 = arith.addf %19, %21 : vector<4x8x1xf32>
    %c0_18 = arith.constant 0 : index
    %c0_19 = arith.constant 0 : index
    %c0_20 = arith.constant 0 : index
    %23 = vector.load %arg8[%c0_18, %c0_19, %c0_20] : memref<4x8x1xf32, #tpu.memory_space<vmem>>, vector<4x8x1xf32>
    tpu.vector_store %arg8[%c0_18, %c0_19, %c0_20], %22 {strides = array<i32>} : memref<4x8x1xf32, #tpu.memory_space<vmem>>, vector<4x8x1xf32>,
    %c0_21 = arith.constant 0 : index
    %c0_22 = arith.constant 0 : index
    %c0_23 = arith.constant 0 : index
    %24 = vector.load %arg9[%c0_21, %c0_22, %c0_23] : memref<4x8x16xf32, #tpu.memory_space<vmem>>, vector<4x8x16xf32>
    %25 = vector.broadcast %14 : vector<4x8x1xf32> to vector<4x8x16xf32>
    %26 = arith.mulf %25, %24 : vector<4x8x16xf32>
    "tpu.trace_start"() <{level = 10 : i32, message = "hqk,hkc->hqc"}> : () -> ()
    %cst_24 = arith.constant dense<0.000000e+00> : vector<4x8x16xf32>
    %27 = tpu.matmul %17, %7, %cst_24 {dimension_numbers = #tpu.dot_dimension_numbers<[2], [1], [1], [2], [0, 0, 0, 1, 1, 2], [0], [0]>} : vector<4x8x8xf32>, vector<4x8x16xf32>, vector<4x8x16xf32> -> vector<4x8x16xf32>
    "tpu.trace_stop"() : () -> ()
    %28 = arith.addf %26, %27 : vector<4x8x16xf32>
    %c0_25 = arith.constant 0 : index
    %c0_26 = arith.constant 0 : index
    %c0_27 = arith.constant 0 : index
    %29 = vector.load %arg9[%c0_25, %c0_26, %c0_27] : memref<4x8x16xf32, #tpu.memory_space<vmem>>, vector<4x8x16xf32>
    tpu.vector_store %arg9[%c0_25, %c0_26, %c0_27], %28 {strides = array<i32>} : memref<4x8x16xf32, #tpu.memory_space<vmem>>, vector<4x8x16xf32>,
    %c0_28 = arith.constant 0 : index
    %c0_29 = arith.constant 0 : index
    %c0_30 = arith.constant 0 : index
    %30 = vector.load %arg7[%c0_28, %c0_29, %c0_30] : memref<4x8x1xf32, #tpu.memory_space<vmem>>, vector<4x8x1xf32>
    tpu.vector_store %arg7[%c0_28, %c0_29, %c0_30], %12 {strides = array<i32>} : memref<4x8x1xf32, #tpu.memory_space<vmem>>, vector<4x8x1xf32>,
    %c0_i32_31 = arith.constant 0 : i32
    %31 = arith.cmpi eq, %arg2, %c0_i32_31 : i32
    %32 = arith.extui %31 : i1 to i32
    %c0_i32_32 = arith.constant 0 : i32
    %33 = arith.cmpi ne, %32, %c0_i32_32 : i32
    scf.if %33 {
      %c0_33 = arith.constant 0 : index
      %c0_34 = arith.constant 0 : index
      %c0_35 = arith.constant 0 : index
      %34 = vector.load %arg8[%c0_33, %c0_34, %c0_35] : memref<4x8x1xf32, #tpu.memory_space<vmem>>, vector<4x8x1xf32>
      %35 = tpu.reciprocal %34 {approx = true} : vector<4x8x1xf32> -> vector<4x8x1xf32>
      %c0_36 = arith.constant 0 : index
      %c0_37 = arith.constant 0 : index
      %c0_38 = arith.constant 0 : index
      %36 = vector.load %arg9[%c0_36, %c0_37, %c0_38] : memref<4x8x16xf32, #tpu.memory_space<vmem>>, vector<4x8x16xf32>
      %37 = vector.broadcast %35 : vector<4x8x1xf32> to vector<4x8x16xf32>
      %38 = arith.mulf %36, %37 : vector<4x8x16xf32>
      %c0_39 = arith.constant 0 : index
      %c0_40 = arith.constant 0 : index
      %c0_41 = arith.constant 0 : index
      %39 = vector.load %arg6[%c0_39, %c0_40, %c0_41] : memref<4x8x16xf32, #tpu.memory_space<vmem>>, vector<4x8x16xf32>
      tpu.vector_store %arg6[%c0_39, %c0_40, %c0_41], %38 {strides = array<i32>} : memref<4x8x16xf32, #tpu.memory_space<vmem>>, vector<4x8x16xf32>,
    } else {
    }
    return
  }
  func.func @transform_0(%arg0: i32, %arg1: i32, %arg2: i32) -> (i32, i32, i32) {
    %c0_i32 = arith.constant 0 : i32
    %c0_i32_0 = arith.constant 0 : i32
    return %arg0, %arg1, %c0_i32 : i32, i32, i32
  }
  func.func @transform_1(%arg0: i32, %arg1: i32, %arg2: i32) -> (i32, i32, i32) {
    %c0_i32 = arith.constant 0 : i32
    %c0_i32_0 = arith.constant 0 : i32
    return %arg0, %arg2, %c0_i32 : i32, i32, i32
  }
  func.func @transform_2(%arg0: i32, %arg1: i32, %arg2: i32) -> (i32, i32, i32) {
    %c0_i32 = arith.constant 0 : i32
    %c0_i32_0 = arith.constant 0 : i32
    return %arg0, %arg2, %c0_i32 : i32, i32, i32
  }
  func.func @transform_3(%arg0: i32, %arg1: i32, %arg2: i32) -> (i32, i32, i32) {
    %c0_i32 = arith.constant 0 : i32
    %c0_i32_0 = arith.constant 0 : i32
    return %arg0, %arg1, %c0_i32 : i32, i32, i32
  }
}

</mosaic_0001>

<bundles_post_ra>
// kernel: tpu_custom_call.1
= control target key start
LH: loop header
LB: loop body
LE: loop exit
PB: predicated region body
PF: predicated region fallthrough
CT: control target
= control target key end

     0   :  { %8 = vsyncpa [#allocation6], 0  ;;  %s1219_s0 = inlined_call_operand.hbm [shape: f32[4,8,16], index: 0, kind: input, shape index: {}]   ;;  %s1220_s1 = inlined_call_operand.hbm [shape: f32[4,8,16], index: 1, kind: input, shape index: {}]   ;;  %s1221_s2 = inlined_call_operand.hbm [shape: f32[4,8,16], index: 2, kind: input, shape index: {}]   ;;  %s1222_s3 = inlined_call_operand.hbm [shape: f32[4,8,16], index: 3, kind: output, shape index: {}]  }
   0x1   :  { %9 = vsyncpa [#allocation9], 0 }
   0x2   :  { %10 = vsyncpa [#allocation7], 0  ;;  %s1072_s12 = smov [#allocation8]   ;;  %s1073_s14 = smov [#allocation5]  }
   0x3   :  { %s28_s13 = sshll.u32 %s1072_s12, 4  ;;  %s16_s15 = sshll.u32 %s1073_s14, 4  ;;  %s29_s13 = int_to_ptr.vmem [resolvable:$true] %s28_s13  ;;  %s17_s15 = int_to_ptr.vmem [resolvable:$true] %s16_s15 }
   0x4   :  { %s994_s16 = scalar_lea.vmem %s29_s13, 512  ;;  %p999_p1 = scmp.lt.s32.totalorder %s29_s13, %s29_s13 }
   0x5   :  { %p995_p0 = scmp.ne.s32.totalorder %s29_s13, %s994_s16  ;;  %p1000_p2 = scmp.lt.s32.totalorder %s994_s16, %s994_s16 }
   0x7   :  { %p1001_p3 = por %p1000_p2, %p999_p1 }
   0x9   :  { %p1002_p4 = pnand %p1001_p3, %p995_p0 }
   0xb   :  { %1005 = shalt.err (!%p1002_p4)
}
   0xc   :  { %s1074_s17 = smov 128   ;;  %s1075_s18 = smov 8  }
   0xd   :  { %34 = dma.hbm_to_vmem [thread:$0]  %s1220_s1, 512, %s29_s13, [#allocation9], %s1074_s17, %s1074_s17, %s1075_s18  }
   0xe   :  { %s1014_s21 = scalar_lea.vmem %s17_s15, 512  ;;  %p1019_p6 = scmp.lt.s32.totalorder %s17_s15, %s17_s15 }
   0xf   :  { %p1015_p5 = scmp.ne.s32.totalorder %s17_s15, %s1014_s21  ;;  %p1020_p7 = scmp.lt.s32.totalorder %s1014_s21, %s1014_s21 }
  0x11   :  { %p1021_p8 = por %p1020_p7, %p1019_p6 }
  0x13   :  { %p1022_p9 = pnand %p1021_p8, %p1015_p5 }
  0x15   :  { %1025 = shalt.err (!%p1022_p9)
}
  0x16   :  { %22 = dma.hbm_to_vmem [thread:$0]  %s1219_s0, 512, %s17_s15, [#allocation6], %s1074_s17, %s1074_s17, %s1075_s18  }
  0x17   :  { %s1076_s24 = smov [#allocation10]  }
  0x18   :  { %s40_s25 = sshll.u32 %s1076_s24, 4  ;;  %s41_s25 = int_to_ptr.vmem [resolvable:$true] %s40_s25 }
  0x19   :  { %s1034_s26 = scalar_lea.vmem %s41_s25, 512  ;;  %p1039_p11 = scmp.lt.s32.totalorder %s41_s25, %s41_s25 }
  0x1a   :  { %p1035_p10 = scmp.ne.s32.totalorder %s41_s25, %s1034_s26  ;;  %p1040_p12 = scmp.lt.s32.totalorder %s1034_s26, %s1034_s26 }
  0x1c   :  { %p1041_p13 = por %p1040_p12, %p1039_p11 }
  0x1e   :  { %p1042_p0 = pnand %p1041_p13, %p1035_p10 }
  0x20   :  { %1045 = shalt.err (!%p1042_p0)
}
  0x21   :  { %46 = dma.hbm_to_vmem [thread:$0]  %s1221_s2, 512, %s41_s25, [#allocation9], %s1074_s17, %s1074_s17, %s1075_s18  }
  0x22   :  { %1066 = dma.done.wait [#allocation6], 512  }
  0x23   :  { %1067 = vsyncadd [#allocation6], 4294966784 }
  0x24   :  { %1068 = dma.done.wait [#allocation9], 1024  }
  0x25   :  { %1069 = vsyncadd [#allocation9], 4294966272  ;;  %vm69_vm0 = vcmask 130048   ;;  %v1077_v0 = vmov 0.0   ;;  %vm1078_vm1 = vmmov 0   ;;  %v82_v1 = vld [vmem:[#allocation8] sm:$0xff] }
  0x26   :  { %910 = vmatprep.subr.mxu0 %v1077_v0  ;;  %70 = vst.msk [vmem:[#allocation4] sm:$0xff] %vm69_vm0, %v1077_v0  ;;  %71 = vst.msk [vmem:[#allocation4 + $0x8] sm:$0xff] %vm69_vm0, %v1077_v0  ;;  %915 = vmatprep.subr.mxu1 %v1077_v0  ;;  %v83_v2 = vld [vmem:[#allocation8 + $0x8] sm:$0xff]  ;;  %v74_v3 = vld [vmem:[#allocation5] sm:$0xff]  ;;  %vm60_vm2 = vcmask 7168   ;;  %v1079_v13 = vmov -inf  }
  0x27   :  { %72 = vst.msk [vmem:[#allocation4 + $0x10] sm:$0xff] %vm69_vm0, %v1077_v0  ;;  %73 = vst.msk [vmem:[#allocation4 + $0x18] sm:$0xff] %vm69_vm0, %v1077_v0  ;;  %912 = vmatprep.mubr.msk.f32.mxu0 %vm1078_vm1, %v1077_v0  ;;  %917 = vmatprep.mubr.msk.f32.mxu1 %vm1078_vm1, %v1077_v0  ;;  %v78_v4 = vmul.f32 0.25, %v74_v3  ;;  %v75_v5 = vld [vmem:[#allocation5 + $0x8] sm:$0xff]  ;;  %v76_v6 = vld [vmem:[#allocation5 + $0x10] sm:$0xff]  ;;  %vm399_vm3 = vcmask 64512  }
  0x28   :  { %911 = vmatpush3.xpose.msk.msra.mxu0 %vm69_vm0, %v82_v1  ;;  %916 = vmatpush3.xpose.msk.msra.mxu1 %vm69_vm0, %v83_v2  ;;  %v79_v7 = vmul.f32 0.25, %v75_v5  ;;  %v84_v8 = vld [vmem:[#allocation8 + $0x10] sm:$0xff]  ;;  %v77_v9 = vld [vmem:[#allocation5 + $0x18] sm:$0xff]  ;;  %v80_v11 = vmul.f32 0.25, %v76_v6  ;;  %61 = vst.msk [vmem:[#allocation2] sm:$0xff] %vm60_vm2, %v1079_v13  ;;  %62 = vst.msk [vmem:[#allocation2 + $0x8] sm:$0xff] %vm60_vm2, %v1079_v13 }
  0x29   :  { %920 = vmatprep.subr.mxu0 %v1077_v0  ;;  %925 = vmatprep.subr.mxu1 %v1077_v0  ;;  %v85_v10 = vld [vmem:[#allocation8 + $0x18] sm:$0xff]  ;;  %v81_v12 = vmul.f32 0.25, %v77_v9  ;;  %63 = vst.msk [vmem:[#allocation2 + $0x10] sm:$0xff] %vm60_vm2, %v1079_v13  ;;  %64 = vst.msk [vmem:[#allocation2 + $0x18] sm:$0xff] %vm60_vm2, %v1079_v13  ;;  %v1080_v26 = vmov 0   ;;  %v86_v43 = vld [vmem:[#allocation10] sm:$0xff] }
  0x2a   :  { %65 = vst.msk [vmem:[#allocation3] sm:$0xff] %vm60_vm2, %v1077_v0  ;;  %66 = vst.msk [vmem:[#allocation3 + $0x8] sm:$0xff] %vm60_vm2, %v1077_v0  ;;  %960 = vset.pattern.permute.xlu0 %v1080_v26  ;;  %961 = vset.pattern.permute.xlu1 %v1080_v26  ;;  %v87_v44 = vld [vmem:[#allocation10 + $0x8] sm:$0xff]  ;;  %v88_v57 = vld [vmem:[#allocation10 + $0x10] sm:$0xff]  ;;  %s1081_s0 = smov [#allocation11]  }
  0x2b   :  { %913 = vmatmul.mubr.msk.f32.vlgmr.msra.gmra.mxu0 %vm69_vm0, %v78_v4  ;;  %918 = vmatmul.mubr.msk.f32.vlgmr.msra.gmra.mxu1 %vm69_vm0, %v79_v7  ;;  %67 = vst.msk [vmem:[#allocation3 + $0x10] sm:$0xff] %vm60_vm2, %v1077_v0  ;;  %68 = vst.msk [vmem:[#allocation3 + $0x18] sm:$0xff] %vm60_vm2, %v1077_v0  ;;  %v89_v60 = vld [vmem:[#allocation10 + $0x18] sm:$0xff]  ;;  %s869_s2 = sshll.u32 %s1081_s0, 4  ;;  %s870_s2 = int_to_ptr.vmem [resolvable:$true] %s869_s2 }
  0x2c   :  { %921 = vmatpush3.xpose.msk.msra.mxu0 %vm69_vm0, %v84_v8  ;;  %922 = vmatprep.mubr.msk.f32.mxu0 %vm1078_vm1, %v1077_v0  ;;  %s1046_s28 = scalar_lea.vmem %s870_s2, 512  ;;  %p1051_p2 = scmp.lt.s32.totalorder %s870_s2, %s870_s2 }
  0x2d   :  { %926 = vmatpush3.xpose.msk.msra.mxu1 %vm69_vm0, %v85_v10  ;;  %927 = vmatprep.mubr.msk.f32.mxu1 %vm1078_vm1, %v1077_v0  ;;  %p1047_p1 = scmp.ne.s32.totalorder %s870_s2, %s1046_s28  ;;  %p1052_p3 = scmp.lt.s32.totalorder %s1046_s28, %s1046_s28 }
  0x2e   :  { %930 = vmatprep.subr.mxu0 %v1077_v0  ;;  %935 = vmatprep.subr.mxu1 %v1077_v0 }
  0x2f   :  { %923 = vmatmul.mubr.msk.f32.vlgmr.msra.gmra.mxu0 %vm69_vm0, %v80_v11  ;;  %v1170_v27 = vld [vmem:[#allocation2] sm:$0xff]  ;;  %v396_v30 = vld [vmem:[#allocation2 + $0x8] sm:$0xff]  ;;  %p1053_p4 = por %p1052_p3, %p1051_p2 }
  0x30   :  { %928 = vmatmul.mubr.msk.f32.vlgmr.msra.gmra.mxu1 %vm69_vm0, %v81_v12  ;;  %932 = vmatprep.mubr.msk.f32.mxu0 %vm1078_vm1, %v1077_v0  ;;  %v1175_v31 = vld [vmem:[#allocation2 + $0x10] sm:$0xff]  ;;  %v398_v37 = vld [vmem:[#allocation2 + $0x18] sm:$0xff] }
  0x31   :  { %937 = vmatprep.mubr.msk.f32.mxu1 %vm1078_vm1, %v1077_v0  ;;  %931 = vmatpush3.msra.mxu0 %v86_v43  ;;  %v460_v11 = vld [vmem:[#allocation3] sm:$0xff]  ;;  %p1054_p5 = pnand %p1053_p4, %p1047_p1 }
  0x32   :  { %940 = vmatprep.subr.mxu0 %v1077_v0  ;;  %936 = vmatpush3.msra.mxu1 %v87_v44 }
  0x33   :  { %945 = vmatprep.subr.mxu1 %v1077_v0 }
  0xeb   :  { %v163_v14 = vpop.f32.mrf.mxu0  ;;  %v239_v15 = vpop.f32.mrf.mxu1 }
  0xec   :  { %v400_v16 = vsel %vm399_vm3, %v163_v14, -inf  ;;  %v403_v19 = vsel %vm399_vm3, %v239_v15, -inf }
  0xed   :  { %401 = vmax.xlane.f32.xlu0 %v400_v16  ;;  %v914_v17 = vpop.f32.mrf.mxu0  ;;  %v919_v18 = vpop.f32.mrf.mxu1 }
  0xee   :  { %v462_v18 = vld [vmem:[#allocation3 + $0x10] sm:$0xff] }
  0xef   :  { %v315_v20 = vpop.f32.mrf.mxu0 }
  0xf0   :  { %v391_v21 = vpop.f32.mrf.mxu1  ;;  %v406_v22 = vsel %vm399_vm3, %v315_v20, -inf }
  0xf1   :  { %404 = vmax.xlane.f32.xlu0 %v403_v19  ;;  %v924_v23 = vpop.f32.mrf.mxu0  ;;  %407 = vmax.xlane.f32.xlu1 %v406_v22  ;;  %v409_v25 = vsel %vm399_vm3, %v391_v21, -inf  ;;  %v463_v22 = vld [vmem:[#allocation3 + $0x18] sm:$0xff] }
  0xf2   :  { %v929_v24 = vpop.f32.mrf.mxu1 }
  0xf5   :  { %410 = vmax.xlane.f32.xlu1 %v409_v25 }
 0x176   :  { %v402_v28 = vpop.xlane.xlu0 %401 }
 0x177   :  { %v1173_v29 = vmax.f32 %v1170_v27, %v402_v28 }
 0x179   :  { %v416_v32 = vsub.f32 %v1170_v27, %v1173_v29  ;;  %817 = vst.msk [vmem:[#allocation2] sm:$0xff] %vm60_vm2, %v1173_v29  ;;  %430 = vperm.xlu0 %960, %v1173_v29  }
 0x17a   :  { %v405_v33 = vpop.xlane.xlu0 %404  ;;  %v408_v34 = vpop.xlane.xlu1 %407 }
 0x17b   :  { %v413_v35 = vmax.f32 %v396_v30, %v405_v33  ;;  %v414_v36 = vmax.f32 %v1175_v31, %v408_v34  ;;  %v420_v4 = vmul.f32 1.442695, %v416_v32 }
 0x17d   :  { %v417_v38 = vsub.f32 %v396_v30, %v413_v35  ;;  %818 = vst.msk [vmem:[#allocation2 + $0x8] sm:$0xff] %vm60_vm2, %v413_v35  ;;  %435 = vperm.xlu1 %961, %v413_v35   ;;  %v418_v39 = vsub.f32 %v1175_v31, %v414_v36  ;;  %819 = vst.msk [vmem:[#allocation2 + $0x10] sm:$0xff] %vm60_vm2, %v414_v36  ;;  %v489_v35 = vld [vmem:[#allocation4] sm:$0xff] }
 0x17e   :  { %v411_v40 = vpop.xlane.xlu1 %410 }
 0x17f   :  { %v415_v41 = vmax.f32 %v398_v37, %v411_v40  ;;  %v422_v2 = vmul.f32 1.442695, %v417_v38  ;;  %v424_v6 = vmul.f32 1.442695, %v418_v39  ;;  %v490_v38 = vld [vmem:[#allocation4 + $0x8] sm:$0xff] }
 0x181   :  { %440 = vperm.xlu1 %961, %v414_v36   ;;  %v419_v42 = vsub.f32 %v398_v37, %v415_v41  ;;  %820 = vst.msk [vmem:[#allocation2 + $0x18] sm:$0xff] %vm60_vm2, %v415_v41 }
 0x183   :  { %v426_v7 = vmul.f32 1.442695, %v419_v42 }
 0x185   :  { %445 = vperm.xlu1 %961, %v415_v41  }
 0x1f4   :  { %v431_v45 = vpop.permute.xlu0 %430 }
 0x1f5   :  { %v448_v46 = vsub.f32 %v163_v14, %v431_v45  ;;  %v461_v14 = vld [vmem:[#allocation3 + $0x8] sm:$0xff]  ;;  %v491_v45 = vld [vmem:[#allocation4 + $0x10] sm:$0xff] }
 0x1f7   :  { %v452_v47 = vmul.f32 1.442695, %v448_v46 }
 0x1f8   :  { %v436_v48 = vpop.permute.xlu1 %435 }
 0x1f9   :  { %962 = vpow2.f32 %v452_v47  ;;  %v449_v49 = vsub.f32 %v239_v15, %v436_v48 }
 0x1fb   :  { %v454_v50 = vmul.f32 1.442695, %v449_v49 }
 0x1fc   :  { %v441_v51 = vpop.permute.xlu1 %440 }
 0x1fd   :  { %964 = vpow2.f32 %v454_v50  ;;  %v450_v52 = vsub.f32 %v315_v20, %v441_v51  ;;  %v492_v50 = vld [vmem:[#allocation4 + $0x18] sm:$0xff] }
 0x1ff   :  { %v456_v53 = vmul.f32 1.442695, %v450_v52 }
 0x200   :  { %v446_v54 = vpop.permute.xlu1 %445 }
 0x201   :  { %966 = vpow2.f32 %v456_v53  ;;  %v451_v55 = vsub.f32 %v391_v21, %v446_v54 }
 0x203   :  { %v458_v56 = vmul.f32 1.442695, %v451_v55 }
 0x205   :  { %968 = vpow2.f32 %v458_v56 }
 0x206   :  { %v963_v58 = vpop.eup %962  ;;  %970 = vpow2.f32 %v422_v2 }
 0x207   :  { %933 = vmatmul.mubr.msk.f32.vlgmr.msra.gmra.mxu0 %vm399_vm3, %v963_v58  ;;  %v468_v59 = vsel %vm399_vm3, %v963_v58, 0.0  ;;  %972 = vpow2.f32 %v420_v4 }
 0x208   :  { %469 = vadd.xlane.f32.xlu1 %v468_v59  ;;  %941 = vmatpush3.msra.mxu0 %v88_v57  ;;  %974 = vpow2.f32 %v424_v6 }
 0x209   :  { %942 = vmatprep.mubr.msk.f32.mxu0 %vm1078_vm1, %v1077_v0  ;;  %976 = vpow2.f32 %v426_v7 }
 0x20a   :  { %v965_v61 = vpop.eup %964 }
 0x20b   :  { %938 = vmatmul.mubr.msk.f32.vlgmr.msra.gmra.mxu1 %vm399_vm3, %v965_v61  ;;  %v471_v62 = vsel %vm399_vm3, %v965_v61, 0.0 }
 0x20c   :  { %472 = vadd.xlane.f32.xlu0 %v471_v62  ;;  %946 = vmatpush3.msra.mxu1 %v89_v60 }
 0x20d   :  { %947 = vmatprep.mubr.msk.f32.mxu1 %vm1078_vm1, %v1077_v0 }
 0x20e   :  { %v967_v63 = vpop.eup %966 }
 0x20f   :  { %943 = vmatmul.mubr.msk.f32.vlgmr.msra.gmra.mxu0 %vm399_vm3, %v967_v63  ;;  %v474_v1 = vsel %vm399_vm3, %v967_v63, 0.0 }
 0x210   :  { %475 = vadd.xlane.f32.xlu1 %v474_v1 }
 0x212   :  { %v969_v3 = vpop.eup %968 }
 0x213   :  { %948 = vmatmul.mubr.msk.f32.vlgmr.msra.gmra.mxu1 %vm399_vm3, %v969_v3  ;;  %v477_v5 = vsel %vm399_vm3, %v969_v3, 0.0  ;;  %v971_v0 = vpop.eup %970 }
 0x214   :  { %478 = vadd.xlane.f32.xlu1 %v477_v5  ;;  %v973_v8 = vpop.eup %972  ;;  %v465_v16 = vmul.f32 %v971_v0, %v461_v14 }
 0x215   :  { %v975_v9 = vpop.eup %974  ;;  %v464_v12 = vmul.f32 %v973_v8, %v460_v11 }
 0x216   :  { %v977_v10 = vpop.eup %976  ;;  %v466_v20 = vmul.f32 %v975_v9, %v462_v18 }
 0x217   :  { %v467_v25 = vmul.f32 %v977_v10, %v463_v22 }
 0x222   :  { %500 = vperm.xlu0 %960, %v971_v0  }
 0x225   :  { %495 = vperm.xlu1 %961, %v973_v8  }
 0x229   :  { %505 = vperm.xlu1 %961, %v975_v9  }
 0x22d   :  { %510 = vperm.xlu1 %961, %v977_v10  }
 0x291   :  { %v470_v13 = vpop.xlane.xlu1 %469 }
 0x292   :  { %v480_v15 = vadd.f32 %v470_v13, %v464_v12 }
 0x294   :  { %485 = vst.msk [vmem:[#allocation3] sm:$0xff] %vm60_vm2, %v480_v15 }
 0x295   :  { %v473_v17 = vpop.xlane.xlu0 %472 }
 0x296   :  { %v481_v19 = vadd.f32 %v473_v17, %v465_v16 }
 0x298   :  { %486 = vst.msk [vmem:[#allocation3 + $0x8] sm:$0xff] %vm60_vm2, %v481_v19 }
 0x299   :  { %v476_v21 = vpop.xlane.xlu1 %475 }
 0x29a   :  { %v482_v23 = vadd.f32 %v476_v21, %v466_v20 }
 0x29b   :  { %v824_v24 = vld [vmem:[#allocation3] sm:$0xff] }
 0x29c   :  { %487 = vst.msk [vmem:[#allocation3 + $0x10] sm:$0xff] %vm60_vm2, %v482_v23  ;;  %978 = vrcp.f32 %v824_v24 }
 0x29d   :  { %v479_v26 = vpop.xlane.xlu1 %478  ;;  %v501_v39 = vpop.permute.xlu0 %500 }
 0x29e   :  { %v483_v27 = vadd.f32 %v479_v26, %v467_v25  ;;  %v514_v44 = vmul.f32 %v501_v39, %v490_v38 }
 0x29f   :  { %v825_v28 = vld [vmem:[#allocation3 + $0x8] sm:$0xff] }
 0x2a0   :  { %488 = vst.msk [vmem:[#allocation3 + $0x18] sm:$0xff] %vm60_vm2, %v483_v27  ;;  %980 = vrcp.f32 %v825_v28 }
 0x2a1   :  { %v496_v36 = vpop.permute.xlu1 %495 }
 0x2a2   :  { %v513_v37 = vmul.f32 %v496_v36, %v489_v35 }
 0x2a3   :  { %v826_v29 = vld [vmem:[#allocation3 + $0x10] sm:$0xff] }
 0x2a4   :  { %982 = vrcp.f32 %v826_v29 }
 0x2a5   :  { %v506_v42 = vpop.permute.xlu1 %505 }
 0x2a6   :  { %v515_v49 = vmul.f32 %v506_v42, %v491_v45 }
 0x2a7   :  { %v827_v30 = vld [vmem:[#allocation3 + $0x18] sm:$0xff] }
 0x2a8   :  { %984 = vrcp.f32 %v827_v30 }
 0x2a9   :  { %v979_v31 = vpop.eup %978  ;;  %v511_v51 = vpop.permute.xlu1 %510 }
 0x2aa   :  { %838 = vperm.xlu1 %961, %v979_v31   ;;  %v516_v55 = vmul.f32 %v511_v51, %v492_v50 }
 0x2ad   :  { %v981_v32 = vpop.eup %980 }
 0x2ae   :  { %843 = vperm.xlu0 %960, %v981_v32  }
 0x2b1   :  { %v983_v33 = vpop.eup %982 }
 0x2b2   :  { %848 = vperm.xlu1 %961, %v983_v33  }
 0x2b5   :  { %v985_v34 = vpop.eup %984 }
 0x2b6   :  { %853 = vperm.xlu0 %960, %v985_v34  }
 0x2c7   :  { %v586_v40 = vpop.f32.mrf.mxu0 }
 0x2c8   :  { %v809_v41 = vadd.f32 %v586_v40, %v513_v37 }
 0x2c9   :  { %v934_v43 = vpop.f32.mrf.mxu0 }
 0x2ca   :  { %813 = vst.msk [vmem:[#allocation4] sm:$0xff] %vm69_vm0, %v809_v41 }
 0x2cb   :  { %v659_v46 = vpop.f32.mrf.mxu1 }
 0x2cc   :  { %v810_v47 = vadd.f32 %v659_v46, %v514_v44 }
 0x2cd   :  { %v939_v48 = vpop.f32.mrf.mxu1 }
 0x2ce   :  { %814 = vst.msk [vmem:[#allocation4 + $0x8] sm:$0xff] %vm69_vm0, %v810_v47 }
 0x2cf   :  { %v732_v52 = vpop.f32.mrf.mxu0 }
 0x2d0   :  { %v811_v53 = vadd.f32 %v732_v52, %v515_v49 }
 0x2d1   :  { %v944_v54 = vpop.f32.mrf.mxu0  ;;  %v832_v59 = vld [vmem:[#allocation4] sm:$0xff] }
 0x2d2   :  { %815 = vst.msk [vmem:[#allocation4 + $0x10] sm:$0xff] %vm69_vm0, %v811_v53 }
 0x2d3   :  { %v805_v56 = vpop.f32.mrf.mxu1 }
 0x2d4   :  { %v812_v57 = vadd.f32 %v805_v56, %v516_v55 }
 0x2d5   :  { %v949_v58 = vpop.f32.mrf.mxu1  ;;  %v833_v62 = vld [vmem:[#allocation4 + $0x8] sm:$0xff] }
 0x2d6   :  { %816 = vst.msk [vmem:[#allocation4 + $0x18] sm:$0xff] %vm69_vm0, %v812_v57 }
 0x2d9   :  { %v834_v2 = vld [vmem:[#allocation4 + $0x10] sm:$0xff] }
 0x2dd   :  { %v835_v6 = vld [vmem:[#allocation4 + $0x18] sm:$0xff] }
 0x325   :  { %v839_v60 = vpop.permute.xlu1 %838 }
 0x326   :  { %v856_v61 = vmul.f32 %v839_v60, %v832_v59 }
 0x328   :  { %860 = vst.msk [vmem:[#allocation11] sm:$0xff] %vm69_vm0, %v856_v61 }
 0x329   :  { %v844_v63 = vpop.permute.xlu0 %843 }
 0x32a   :  { %v857_v1 = vmul.f32 %v844_v63, %v833_v62 }
 0x32c   :  { %861 = vst.msk [vmem:[#allocation11 + $0x8] sm:$0xff] %vm69_vm0, %v857_v1 }
 0x32d   :  { %v849_v3 = vpop.permute.xlu1 %848 }
 0x32e   :  { %v858_v4 = vmul.f32 %v849_v3, %v834_v2 }
 0x330   :  { %862 = vst.msk [vmem:[#allocation11 + $0x10] sm:$0xff] %vm69_vm0, %v858_v4 }
 0x331   :  { %v854_v5 = vpop.permute.xlu0 %853 }
 0x332   :  { %v859_v7 = vmul.f32 %v854_v5, %v835_v6 }
 0x334   :  { %863 = vst.msk [vmem:[#allocation11 + $0x18] sm:$0xff] %vm69_vm0, %v859_v7 }
 0x335   :  { %1057 = shalt.err (!%p1054_p5)
}
 0x336   :  { %875 = dma.vmem_to_hbm [thread:$0]  %s870_s2, 512, %s1222_s3, [#allocation7], %s1074_s17, %s1074_s17, %s1075_s18  }
 0x337   :  { %1070 = dma.done.wait [#allocation7], 512  }
 0x338   :  { %1071 = vsyncadd [#allocation7], 4294966784 }
 0x339   :  { %879 = vsyncpa [#allocation6], 1 }
 0x33a   :  { %880 = vsyncpa [#allocation9], 1 }
 0x33b   :  { %881 = vsyncpa [#allocation7], 1 }

</bundles_post_ra>
